<compile_context>
chip_gen: v7x
topology: tpu7x:2x2x1
jax: 0.10.0
libtpu: 0.0.40
codegen_flags: <defaults>
</compile_context>

<pallas_src>
import functools
import math

import jax
import jax.numpy as jnp
from jax.experimental import pallas as pl
from jax.experimental.pallas import tpu as pltpu

_LANE = 128
_EPS = 1e-5


def _round_up(v, m):
    return (v + m - 1) // m * m


def _const_spec(shape):
    zero = (0,) * len(shape)
    return pl.BlockSpec(shape, lambda i, _z=zero: _z)


def _batch_spec(shape):
    tail = (0,) * (len(shape) - 1)
    return pl.BlockSpec(shape, lambda i, _t=tail: (i,) + _t)


# ---------------------------------------------------------------------------
# Kernel 1: streamed per-channel sum / sum-of-squares (BN1 statistics).
# ---------------------------------------------------------------------------
def _bn_stats_kernel(x_ref, o_ref):
    @pl.when(pl.program_id(0) == 0)
    def _init():
        o_ref[...] = jnp.zeros_like(o_ref)

    xb = x_ref[...]                                      # (TM, C) f32
    o_ref[0:1, :] += jnp.sum(xb, axis=0, keepdims=True)
    o_ref[1:2, :] += jnp.sum(xb * xb, axis=0, keepdims=True)


def _channel_stats(x_flat, tile_m=256):
    m, c = x_flat.shape
    mp = _round_up(m, tile_m)
    if mp != m:                      # zero rows add nothing to sum / sumsq
        x_flat = jnp.pad(x_flat, ((0, mp - m), (0, 0)))
    out = pl.pallas_call(
        _bn_stats_kernel,
        grid=(mp // tile_m,),
        in_specs=[pl.BlockSpec((tile_m, c), lambda i: (i, 0))],
        out_specs=pl.BlockSpec((8, c), lambda i: (0, 0)),
        out_shape=jax.ShapeDtypeStruct((8, c), jnp.float32),
        compiler_params=pltpu.CompilerParams(
            dimension_semantics=("arbitrary",)),
    )(x_flat)
    return out[0], out[1]


# ---------------------------------------------------------------------------
# Kernel 2: relu(bn1) + conv1 (3x3, stride s) + projection residual
#           + per-image partial BN2 statistics.  One image per grid step.
# ---------------------------------------------------------------------------
def _conv1_kernel(x_ref, s1_ref, t1_ref, w1_ref, *rest,
                  h, w, h_out, w_out, stride, equal_in_out):
    if equal_in_out:
        h1_ref, st2_ref, y1p_ref = rest
        wres_ref = res_ref = None
    else:
        wres_ref, h1_ref, st2_ref, res_ref, y1p_ref = rest

    cin_p = x_ref.shape[-1]
    m = h_out * w_out
    zdt = y1p_ref.dtype

    # BN1 + ReLU applied once per element; broadcasts hoisted out of tap loop.
    scale1 = s1_ref[...].reshape(1, 1, cin_p)
    shift1 = t1_ref[...].reshape(1, 1, cin_p)
    y1 = jnp.maximum(x_ref[0] * scale1 + shift1, 0.0)

    # conv1 zero-pads y1 (NOT x): zero only the 1-px border, every step so it
    # is correct even when the "parallel" grid is sharded across TensorCores.
    y1p_ref[0:1, :, :] = jnp.zeros((1, w + 2, cin_p), zdt)
    y1p_ref[h + 1:h + 2, :, :] = jnp.zeros((1, w + 2, cin_p), zdt)
    y1p_ref[:, 0:1, :] = jnp.zeros((h + 2, 1, cin_p), zdt)
    y1p_ref[:, w + 1:w + 2, :] = jnp.zeros((h + 2, 1, cin_p), zdt)
    y1p_ref[1:h + 1, 1:w + 1, :] = y1.astype(zdt)

    def tap(kh, kw):
        if stride == 1:
            t = y1p_ref[kh:kh + h_out, kw:kw + w_out, :]
        else:
            t = y1p_ref[pl.ds(kh, h_out, stride), pl.ds(kw, w_out, stride), :]
        return t.reshape(m, cin_p)                       # bf16 MXU operand

    # 3x3 stride-s conv as 9 accumulated MXU matmuls with lane-aligned K.
    acc = jnp.zeros((m, w1_ref.shape[-1]), jnp.float32)
    centre = None
    for ti in range(9):
        kh, kw = divmod(ti, 3)
        tp = tap(kh, kw)
        if ti == 4:
            centre = tp
        acc = acc + jnp.dot(tp, w1_ref[ti],
                            preferred_element_type=jnp.float32)

    h1_ref[0] = acc

    # Per-image partial BN2 statistics (single pass, f32 accumulation).
    st2_ref[0, 0:1, :] = jnp.sum(acc, axis=0, keepdims=True)
    st2_ref[0, 1:2, :] = jnp.sum(acc * acc, axis=0, keepdims=True)

    # Projection residual: 1x1 stride-s conv on y1 == the (strided) centre tap.
    if not equal_in_out:
        res_ref[0] = jnp.dot(centre, wres_ref[...],
                             preferred_element_type=jnp.float32)


# ---------------------------------------------------------------------------
# Kernel 3: relu(bn2) + conv2 (3x3, stride 1) + residual add.
# ---------------------------------------------------------------------------
def _conv2_kernel(h1_ref, s2_ref, t2_ref, w2_ref, res_ref, out_ref, y2p_ref,
                  *, h_out, w_out):
    cout_p = w2_ref.shape[-1]
    m = h_out * w_out
    zdt = y2p_ref.dtype

    # BN2 + ReLU (training-mode scale/shift from the streamed statistics).
    hmid = jnp.maximum(h1_ref[0] * s2_ref[...] + t2_ref[...], 0.0)
    # droprate == 0.0 -> F.dropout is a no-op.

    y2p_ref[0:1, :, :] = jnp.zeros((1, w_out + 2, cout_p), zdt)
    y2p_ref[h_out + 1:h_out + 2, :, :] = jnp.zeros((1, w_out + 2, cout_p), zdt)
    y2p_ref[:, 0:1, :] = jnp.zeros((h_out + 2, 1, cout_p), zdt)
    y2p_ref[:, w_out + 1:w_out + 2, :] = jnp.zeros((h_out + 2, 1, cout_p), zdt)
    y2p_ref[1:h_out + 1, 1:w_out + 1, :] = (
        hmid.reshape(h_out, w_out, cout_p).astype(zdt))

    acc = jnp.zeros((m, cout_p), jnp.float32)
    for ti in range(9):
        kh, kw = divmod(ti, 3)
        patch = y2p_ref[kh:kh + h_out, kw:kw + w_out, :].reshape(m, cout_p)
        acc = acc + jnp.dot(patch, w2_ref[ti],
                            preferred_element_type=jnp.float32)

    out_ref[0] = res_ref[0] + acc


# ---------------------------------------------------------------------------
# Wrapper: NCHW in / NCHW out, mirrors BasicBlock.forward (use_bn branch).
# ---------------------------------------------------------------------------
def basic_block_forward(x_nchw, params, stride):
    n, cin, h, w = x_nchw.shape
    cout = params["w1"].shape[0]
    equal_in_out = (cin == cout)
    h_out = (h + 2 - 3) // stride + 1
    w_out = (w + 2 - 3) // stride + 1
    m_out = h_out * w_out
    if equal_in_out:
        assert stride == 1, "identity residual needs matching spatial shape"
    else:
        # centre-tap shortcut: 1x1 stride-s (no pad) grid == 3x3 pad-1 grid
        assert (h - 1) // stride + 1 == h_out
        assert (w - 1) // stride + 1 == w_out

    cin_p = _round_up(cin, _LANE)
    cout_p = _round_up(cout, _LANE)

    x_nhwc = jnp.transpose(x_nchw, (0, 2, 3, 1)).astype(jnp.float32)
    x_p = jnp.pad(x_nhwc, ((0, 0), (0, 0), (0, 0), (0, cin_p - cin)))

    # ---- BN1 statistics, streamed over row tiles --------------------------
    m_in = n * h * w
    sum1, sumsq1 = _channel_stats(x_p.reshape(m_in, cin_p))
    mean1 = sum1 / m_in
    var1 = jnp.maximum(sumsq1 / m_in - mean1 * mean1, 0.0)
    g1 = jnp.pad(params["gamma1"].astype(jnp.float32), (0, cin_p - cin))
    b1 = jnp.pad(params["beta1"].astype(jnp.float32), (0, cin_p - cin))
    sc1 = g1 * jax.lax.rsqrt(var1 + _EPS)
    scale1 = sc1.reshape(1, cin_p)
    shift1 = (b1 - mean1 * sc1).reshape(1, cin_p)

    # ---- weights: HWIO, channel-padded to lane multiples, bf16 operands ---
    def _prep3x3(wt, ci, co, ci_p, co_p):
        wt = jnp.transpose(wt.astype(jnp.float32), (2, 3, 1, 0))   # (3,3,ci,co)
        wt = jnp.pad(wt, ((0, 0), (0, 0), (0, ci_p - ci), (0, co_p - co)))
        return wt.reshape(9, ci_p, co_p).astype(jnp.bfloat16)

    w1 = _prep3x3(params["w1"], cin, cout, cin_p, cout_p)
    w2 = _prep3x3(params["w2"], cout, cout, cout_p, cout_p)

    # ---- conv1 (+ projection residual + partial BN2 stats), one image/step
    inputs = [x_p, scale1, shift1, w1]
    in_specs = [_batch_spec((1, h, w, cin_p)),
                _const_spec((1, cin_p)),
                _const_spec((1, cin_p)),
                _const_spec((9, cin_p, cout_p))]
    out_shape = [jax.ShapeDtypeStruct((n, m_out, cout_p), jnp.float32),
                 jax.ShapeDtypeStruct((n, 2, cout_p), jnp.float32)]
    out_specs = [_batch_spec((1, m_out, cout_p)),
                 _batch_spec((1, 2, cout_p))]
    if not equal_in_out:
        wres = jnp.transpose(params["w_res"][:, :, 0, 0].astype(jnp.float32),
                             (1, 0))
        wres = jnp.pad(wres, ((0, cin_p - cin), (0, cout_p - cout)))
        inputs.append(wres.astype(jnp.bfloat16))
        in_specs.append(_const_spec((cin_p, cout_p)))
        out_shape.append(jax.ShapeDtypeStruct((n, m_out, cout_p), jnp.float32))
        out_specs.append(_batch_spec((1, m_out, cout_p)))

    conv1 = pl.pallas_call(
        functools.partial(_conv1_kernel, h=h, w=w, h_out=h_out, w_out=w_out,
                          stride=stride, equal_in_out=equal_in_out),
        grid=(n,),
        in_specs=in_specs,
        out_specs=out_specs,
        out_shape=out_shape,
        scratch_shapes=[pltpu.VMEM((h + 2, w + 2, cin_p), jnp.bfloat16)],
        compiler_params=pltpu.CompilerParams(
            dimension_semantics=("parallel",)),
    )(*inputs)
    if equal_in_out:
        h1, st2 = conv1
        res = x_p.reshape(n, h * w, cin_p)         # identity residual (f32)
    else:
        h1, st2, res = conv1

    # ---- BN2 scale/shift from the streamed partial sums (O(C) glue) -------
    st2_tot = jnp.sum(st2, axis=0)
    m2 = n * m_out
    mean2 = st2_tot[0] / m2
    var2 = jnp.maximum(st2_tot[1] / m2 - mean2 * mean2, 0.0)
    g2 = jnp.pad(params["gamma2"].astype(jnp.float32), (0, cout_p - cout))
    b2 = jnp.pad(params["beta2"].astype(jnp.float32), (0, cout_p - cout))
    sc2 = g2 * jax.lax.rsqrt(var2 + _EPS)
    scale2 = sc2.reshape(1, cout_p)
    shift2 = (b2 - mean2 * sc2).reshape(1, cout_p)

    # ---- relu(bn2) + conv2 + residual add, one image per grid step --------
    out_flat = pl.pallas_call(
        functools.partial(_conv2_kernel, h_out=h_out, w_out=w_out),
        grid=(n,),
        in_specs=[_batch_spec((1, m_out, cout_p)),
                  _const_spec((1, cout_p)),
                  _const_spec((1, cout_p)),
                  _const_spec((9, cout_p, cout_p)),
                  _batch_spec((1, m_out, cout_p))],
        out_specs=_batch_spec((1, m_out, cout_p)),
        out_shape=jax.ShapeDtypeStruct((n, m_out, cout_p), jnp.float32),
        scratch_shapes=[pltpu.VMEM((h_out + 2, w_out + 2, cout_p),
                                   jnp.bfloat16)],
        compiler_params=pltpu.CompilerParams(
            dimension_semantics=("parallel",)),
    )(h1, scale2, shift2, w2, res)

    out = out_flat.reshape(n, h_out, w_out, cout_p)[..., :cout]
    return jnp.transpose(out, (0, 3, 1, 2))            # back to NCHW


# ---------------------------------------------------------------------------
# Parameters + pure-JAX reference (mirrors the PyTorch forward, use_bn branch)
# ---------------------------------------------------------------------------
def init_params(key, in_planes, out_planes):
    ks = jax.random.split(key, 7)
    p = {
        "gamma1": 1.0 + 0.1 * jax.random.normal(ks[0], (in_planes,), jnp.float32),
        "beta1": 0.1 * jax.random.normal(ks[1], (in_planes,), jnp.float32),
        "gamma2": 1.0 + 0.1 * jax.random.normal(ks[2], (out_planes,), jnp.float32),
        "beta2": 0.1 * jax.random.normal(ks[3], (out_planes,), jnp.float32),
        "w1": jax.random.normal(ks[4], (out_planes, in_planes, 3, 3),
                                jnp.float32) * math.sqrt(2.0 / (9 * in_planes)),
        "w2": jax.random.normal(ks[5], (out_planes, out_planes, 3, 3),
                                jnp.float32) * math.sqrt(2.0 / (9 * out_planes)),
    }
    if in_planes != out_planes:
        p["w_res"] = jax.random.normal(
            ks[6], (out_planes, in_planes, 1, 1),
            jnp.float32) * math.sqrt(2.0 / in_planes)
    return p


def ref_forward(x, params, stride):
    hp = jax.lax.Precision.HIGHEST

    def bn(v, g, b):
        mean = v.mean(axis=(0, 2, 3), keepdims=True)
        var = ((v - mean) ** 2).mean(axis=(0, 2, 3), keepdims=True)
        return ((v - mean) * jax.lax.rsqrt(var + _EPS)
                * g.reshape(1, -1, 1, 1) + b.reshape(1, -1, 1, 1))

    dn = ("NCHW", "OIHW", "NCHW")
    x_out = jax.nn.relu(bn(x, params["gamma1"], params["beta1"]))
    c1 = jax.lax.conv_general_dilated(x_out, params["w1"], (stride, stride),
                                      ((1, 1), (1, 1)), dimension_numbers=dn,
                                      precision=hp)
    out = jax.nn.relu(bn(c1, params["gamma2"], params["beta2"]))
    out = jax.lax.conv_general_dilated(out, params["w2"], (1, 1),
                                       ((1, 1), (1, 1)), dimension_numbers=dn,
                                       precision=hp)
    if "w_res" not in params:
        return x + out
    res = jax.lax.conv_general_dilated(x_out, params["w_res"], (stride, stride),
                                       ((0, 0), (0, 0)), dimension_numbers=dn,
                                       precision=hp)
    return res + out


if __name__ == "__main__":
    key = jax.random.PRNGKey(0)
    kx, kpa, kpb = jax.random.split(key, 3)
    x = jax.random.normal(kx, (2, 4, 16, 16), jnp.float32)

    # Config A: equalInOut (in=out=4, stride=1) -> identity residual.
    params_a = init_params(kpa, 4, 4)
    out_a = basic_block_forward(x, params_a, stride=1)

    # Config B: in=4 -> out=8, stride=2 -> 1x1 projection residual.
    params_b = init_params(kpb, 4, 8)
    out_b = basic_block_forward(x, params_b, stride=2)

    jax.block_until_ready((out_a, out_b))
    assert out_a.shape == (2, 4, 16, 16)
    assert out_b.shape == (2, 8, 8, 8)

    ref_a = ref_forward(x, params_a, 1)
    ref_b = ref_forward(x, params_b, 2)

    def _check(o, r, name):
        err = float(jnp.max(jnp.abs(o - r)))
        scale = float(jnp.max(jnp.abs(r)))
        # bf16 MXU operands (f32 accumulate) -> scale-aware tolerance.
        assert err <= 2e-2 * scale + 2e-2, (name, err, scale)

    _check(out_a, ref_a, "equalInOut_stride1")
    _check(out_b, ref_b, "projection_stride2")
    print("KERNEL_OK")
</pallas_src>

<mosaic_0001>
module attributes {stable_mosaic.version = 11 : i64} {
  func.func @_bn_stats_kernel(%arg0: i32, %arg1: memref<256x128xf32, #tpu.memory_space<vmem>>, %arg2: memref<8x128xf32, #tpu.memory_space<vmem>>) attributes {dimension_semantics = [#tpu.dimension_semantics<arbitrary>], iteration_bounds = array<i64: 2>, scalar_prefetch = 0 : i64, scratch_operands = 0 : i64, tpu.core_type = #tpu.core_type<tc>, window_params = [{transform_indices = @transform_0, window_bounds = array<i64: 256, 128>}, {pipeline_mode = #tpu.pipeline_mode<synchronous>, transform_indices = @transform_1, window_bounds = array<i64: 8, 128>}]} {
    %c0_i32 = arith.constant 0 : i32
    %0 = arith.cmpi eq, %arg0, %c0_i32 : i32
    %1 = arith.extui %0 : i1 to i32
    %c0_i32_0 = arith.constant 0 : i32
    %2 = arith.cmpi ne, %1, %c0_i32_0 : i32
    scf.if %2 {
      %cst_10 = arith.constant 0.000000e+00 : f32
      %15 = vector.broadcast %cst_10 : f32 to vector<8x128xf32>
      %c0_11 = arith.constant 0 : index
      %c0_12 = arith.constant 0 : index
      %16 = vector.load %arg2[%c0_11, %c0_12] : memref<8x128xf32, #tpu.memory_space<vmem>>, vector<8x128xf32>
      tpu.vector_store %arg2[%c0_11, %c0_12], %15 {strides = array<i32>} : memref<8x128xf32, #tpu.memory_space<vmem>>, vector<8x128xf32>,
    } else {
    }
    %c0 = arith.constant 0 : index
    %c0_1 = arith.constant 0 : index
    %3 = vector.load %arg1[%c0, %c0_1] : memref<256x128xf32, #tpu.memory_space<vmem>>, vector<256x128xf32>
    %c0_2 = arith.constant 0 : index
    %c0_3 = arith.constant 0 : index
    %4 = vector.load %arg2[%c0_2, %c0_3] : memref<8x128xf32, #tpu.memory_space<vmem>>, vector<1x128xf32>
    %cst = arith.constant dense<0.000000e+00> : vector<128xf32>
    %5 = vector.multi_reduction <add>, %3, %cst [0] : vector<256x128xf32> to vector<128xf32>
    %6 = vector.shape_cast %5 : vector<128xf32> to vector<1x128xf32>
    %7 = arith.addf %4, %6 : vector<1x128xf32>
    %c0_4 = arith.constant 0 : index
    %c0_5 = arith.constant 0 : index
    %8 = vector.load %arg2[%c0_4, %c0_5] : memref<8x128xf32, #tpu.memory_space<vmem>>, vector<1x128xf32>
    tpu.vector_store %arg2[%c0_4, %c0_5], %7 {strides = array<i32>} : memref<8x128xf32, #tpu.memory_space<vmem>>, vector<1x128xf32>,
    %c1 = arith.constant 1 : index
    %c0_6 = arith.constant 0 : index
    %9 = vector.load %arg2[%c1, %c0_6] : memref<8x128xf32, #tpu.memory_space<vmem>>, vector<1x128xf32>
    %10 = arith.mulf %3, %3 : vector<256x128xf32>
    %cst_7 = arith.constant dense<0.000000e+00> : vector<128xf32>
    %11 = vector.multi_reduction <add>, %10, %cst_7 [0] : vector<256x128xf32> to vector<128xf32>
    %12 = vector.shape_cast %11 : vector<128xf32> to vector<1x128xf32>
    %13 = arith.addf %9, %12 : vector<1x128xf32>
    %c1_8 = arith.constant 1 : index
    %c0_9 = arith.constant 0 : index
    %14 = vector.load %arg2[%c1_8, %c0_9] : memref<8x128xf32, #tpu.memory_space<vmem>>, vector<1x128xf32>
    tpu.vector_store %arg2[%c1_8, %c0_9], %13 {strides = array<i32>} : memref<8x128xf32, #tpu.memory_space<vmem>>, vector<1x128xf32>,
    return
  }
  func.func @transform_0(%arg0: i32) -> (i32, i32) {
    %c0_i32 = arith.constant 0 : i32
    %c0_i32_0 = arith.constant 0 : i32
    return %arg0, %c0_i32 : i32, i32
  }
  func.func @transform_1(%arg0: i32) -> (i32, i32) {
    %c0_i32 = arith.constant 0 : i32
    %c0_i32_0 = arith.constant 0 : i32
    %c0_i32_1 = arith.constant 0 : i32
    return %c0_i32, %c0_i32_0 : i32, i32
  }
}

</mosaic_0001>

<bundles_post_ra>
// kernel: tpu_custom_call.1
= control target key start
LH: loop header
LB: loop body
LE: loop exit
PB: predicated region body
PF: predicated region fallthrough
CT: control target
= control target key end

     0   :  { %6 = vsyncpa [#allocation3], 0  ;;  %s665_s0 = inlined_call_operand.hbm [shape: f32[512,128], index: 0, kind: input, shape index: {}]   ;;  %s666_s1 = inlined_call_operand.hbm [shape: f32[8,128], index: 1, kind: output, shape index: {}]  }
   0x1   :  { %8 = vsyncpa [#allocation3 + $0x1], 0 }
   0x2   :  { %9 = vsyncpa [#allocation4], 0  ;;  %s504_s6 = smov 0   ;;  %s506_s7 = smov 0  }
   0x3   :  { %s508_s8 = smov 0   ;;  %s510_s9 = smov 0  }
   0x4 LB: > { %s523_s10 = sadd.s32 4294967295, %s487_s9   ;;  %s526_s11 = sadd.s32 1, %s487_s9   ;;  %s487_s9 = sphi %s510_s9, %s673_s9   ;;  %s483_s8 = sphi %s508_s8, %s672_s8   ;;  %s479_s7 = sphi %s506_s7, %s671_s7   ;;  %s475_s6 = sphi %s504_s6, %s670_s6  }
   0x5   : > { %s19_s12 = ssub.s32 %s487_s9, %s526_s11  ;;  %s22_s13 = sadd.s32 1, %s483_s8 }
   0x6   : > { %p20_p0 = scmp.eq.s32.totalorder %s19_s12, 0  ;;  %p29_p1 = scmp.ne.s32.totalorder %s483_s8, %s479_s7 }
   0x7   : > { %p30_p2 = scmp.eq.s32.totalorder %s487_s9, 0  ;;  %p35_p3 = scmp.ne.s32.totalorder %s479_s7, %s475_s6 }
   0x8   : > { %s536_s14 = scalar_select %p20_p0, %s483_s8, %s22_s13  }
   0x9   : > { %p31_p4 = por %p30_p2, %p29_p1  ;;  %p36_p5 = scmp.eq.s32.totalorder %s523_s10, 0 }
   0xa   : > { %p354_p6 = scmp.lt.s32.totalorder %s487_s9, 2  ;;  %s80_s16 = sand.u32 1, %s483_s8  }
   0xb   : > { %p540_p7 = por %p36_p5, %p35_p3  ;;  %s333_s17 = sshll.u32 %s80_s16, 8 }
   0xc   : > { %s343_s18 = sshll.u32 %s487_s9, 12  ;;  %s84_s22 = scalar_lea.vmem [#allocation2], %s333_s17 }
   0xd   : > { %s549_s21 = scalar_lea.hbm %s665_s0, %s343_s18  ;;  %s91_s23 = sshll.u32 %s84_s22, 4  ;;  %s551_s23 = int_to_ptr.vmem [resolvable:$true] %s91_s23 }
   0xe   : > { %p553_p8 = pnand %p354_p6, %p31_p4  ;;  %s558_s25 = scalar_lea.sflag [#allocation3], %s80_s16 }
   0xf   : > { %s393_s26 = scalar_lea.hbm %s549_s21, 4096  ;;  %s398_s29 = scalar_lea.hbm %s665_s0, 8192 }
  0x10   : > { %p394_p10 = scmp.ne.s32.totalorder %s549_s21, %s393_s26  ;;  %p395_p11 = pneg %p553_p8 }
  0x11   : > { %p399_p0 = scmp.lt.u32.totalorder %s549_s21, %s665_s0  ;;  %p400_p1 = scmp.lt.u32.totalorder %s398_s29, %s393_s26 }
  0x12   : > { %p396_p12 = pnand %p395_p11, %p394_p10  ;;  %p402_p3 = scmp.lt.u32.totalorder %s393_s26, %s549_s21 }
  0x13   : > { %p401_p2 = por %p400_p1, %p399_p0 }
  0x14   : > { %p397_p13 = pneg %p396_p12 }
  0x15   : > { %p403_p4 = por %p402_p3, %p401_p2 }
  0x17   : > { %p404_p5 = pnand %p403_p4, %p397_p13 }
  0x19   : > { %407 = shalt.err (!%p404_p5)
}
  0x1a   : > { %s408_s3 = scalar_lea.vmem %s551_s23, 4096  ;;  %s489_s4 = smov [#allocation2]  }
  0x1b   : > { %p409_p6 = scmp.ne.s32.totalorder %s551_s23, %s408_s3  ;;  %s413_s5 = sshll.u32 %s489_s4, 4  ;;  %s414_s5 = int_to_ptr.vmem [resolvable:$false] %s413_s5 }
  0x1c   : > { %s415_s6 = scalar_lea.vmem %s414_s5, 8192  ;;  %p416_p9 = scmp.lt.s32.totalorder %s551_s23, %s414_s5 }
  0x1d   : > { %p411_p10 = pnand %p409_p6, %p395_p11  ;;  %p417_p0 = scmp.lt.s32.totalorder %s415_s6, %s408_s3 }
  0x1f   : > { %p412_p12 = pneg %p411_p10  ;;  %p418_p1 = por %p417_p0, %p416_p9 }
  0x21   : > { %p419_p2 = pnand %p418_p1, %p412_p12 }
  0x23   : > { %422 = shalt.err (!%p419_p2)
}
  0x24   : > { %s490_s12 = smov 128   ;;  %s491_s13 = smov 8  }
  0x25   : > { %353 = dma.hbm_to_vmem [thread:$0]  (!%p553_p8), %s549_s21, 4096, %s551_s23, %s558_s25, %s490_s12, %s490_s12, %s491_s13  }
  0x26   : > { %p99_p11 = scmp.lt.s32.totalorder %s487_s9, 3  ;;  %p669_p13 = scmp.ge.s32.totalorder %s487_s9, 1 }
  0x28   : > { %p100_p3 = pnand %p669_p13, %p99_p11 }
  0x29   : > { %s105_s16 = sand.u32 (!%p100_p3), 1, %s479_s7  }
  0x2a   : > { %103 = sbr.rel (%p100_p3) target bundleno = 153 (0x99), region = 24  ;;  %s337_s17 = sshll.u32 (!%p100_p3), %s105_s16, 8 }
  0x2b   : > { %s106_s18 = scalar_lea.sflag (!%p100_p3), [#allocation3], %s105_s16  ;;  %s590_s19 = scalar_lea.vmem (!%p100_p3), [#allocation2], %s337_s17 }
  0x31   : > { %466 = dma.done.wait (%p540_p7), %s106_s18, 4096  }
  0x32   : > { %468 = vsyncadd (%p540_p7), %s106_s18, 4294963200  ;;  %p338_p9 = scmp.ne.s32.totalorder %s523_s10, 0 }
  0x33   : > { %v492_v0 = vmov (!%p338_p9), 0.0  }
  0x34   : > { %127 = sbr.rel (%p338_p9) target bundleno = 59 (0x3b), region = 32  ;;  %128 = vst [vmem:[#allocation5] sm:$0xff] (!%p338_p9), %v492_v0 }
  0x3b PF: > { %v129_v1 = vld [vmem:[%s590_s19] sm:$0xff]  ;;  %v130_v2 = vld [vmem:[%s590_s19 + $0x8] sm:$0xff]  ;;  %v131_v3 = vld [vmem:[%s590_s19 + $0x10] sm:$0xff]  ;;  %s493_s9 = smov [#allocation5]   ;;  %p355_p7 = scmp.eq.s32.totalorder %s523_s10, 1 }
  0x3c   : > { %v132_v4 = vld [vmem:[%s590_s19 + $0x18] sm:$0xff]  ;;  %v162_v5 = vadd.f32 %v130_v2, %v129_v1  ;;  %v202_v6 = vmul.f32 %v129_v1, %v129_v1  ;;  %v203_v7 = vmul.f32 %v130_v2, %v130_v2  ;;  %v204_v8 = vmul.f32 %v131_v3, %v131_v3  ;;  %v133_v9 = vld [vmem:[%s590_s19 + $0x20] sm:$0xff]  ;;  %v134_v13 = vld [vmem:[%s590_s19 + $0x28] sm:$0xff]  ;;  %s280_s15 = sshll.u32 %s493_s9, 4  ;;  %s281_s15 = int_to_ptr.vmem [resolvable:$true] %s280_s15 }
  0x3d   : > { %v205_v11 = vmul.f32 %v132_v4, %v132_v4  ;;  %v206_v15 = vmul.f32 %v133_v9, %v133_v9  ;;  %v135_v17 = vld [vmem:[%s590_s19 + $0x30] sm:$0xff]  ;;  %v207_v19 = vmul.f32 %v134_v13, %v134_v13  ;;  %v136_v21 = vld [vmem:[%s590_s19 + $0x38] sm:$0xff]  ;;  %v137_v25 = vld [vmem:[%s590_s19 + $0x40] sm:$0xff]  ;;  %s423_s20 = scalar_lea.vmem %s281_s15, 128  ;;  %p430_p6 = scmp.lt.s32.totalorder %s281_s15, %s281_s15 }
  0x3e   : > { %v163_v10 = vadd.f32 %v162_v5, %v131_v3  ;;  %v234_v12 = vadd.f32 %v203_v7, %v202_v6  ;;  %v208_v23 = vmul.f32 %v135_v17, %v135_v17  ;;  %v209_v27 = vmul.f32 %v136_v21, %v136_v21  ;;  %v138_v29 = vld [vmem:[%s590_s19 + $0x48] sm:$0xff]  ;;  %v139_v33 = vld [vmem:[%s590_s19 + $0x50] sm:$0xff]  ;;  %v140_v37 = vld [vmem:[%s590_s19 + $0x58] sm:$0xff]  ;;  %p424_p8 = scmp.ne.s32.totalorder %s281_s15, %s423_s20  ;;  %p431_p10 = scmp.lt.s32.totalorder %s423_s20, %s423_s20 }
  0x3f   : > { %v210_v31 = vmul.f32 %v137_v25, %v137_v25  ;;  %v211_v35 = vmul.f32 %v138_v29, %v138_v29  ;;  %v212_v39 = vmul.f32 %v139_v33, %v139_v33  ;;  %v141_v41 = vld [vmem:[%s590_s19 + $0x60] sm:$0xff]  ;;  %v213_v43 = vmul.f32 %v140_v37, %v140_v37  ;;  %v142_v45 = vld [vmem:[%s590_s19 + $0x68] sm:$0xff]  ;;  %v143_v49 = vld [vmem:[%s590_s19 + $0x70] sm:$0xff] }
  0x40   : > { %v164_v14 = vadd.f32 %v163_v10, %v132_v4  ;;  %v235_v16 = vadd.f32 %v234_v12, %v204_v8  ;;  %v214_v47 = vmul.f32 %v141_v41, %v141_v41  ;;  %v215_v51 = vmul.f32 %v142_v45, %v142_v45  ;;  %v144_v53 = vld [vmem:[%s590_s19 + $0x78] sm:$0xff]  ;;  %v145_v57 = vld [vmem:[%s590_s19 + $0x80] sm:$0xff]  ;;  %v146_v61 = vld [vmem:[%s590_s19 + $0x88] sm:$0xff]  ;;  %p425_p4 = pnand %p424_p8, %p355_p7  ;;  %p432_p12 = por %p431_p10, %p430_p6 }
  0x41   : > { %v216_v55 = vmul.f32 %v143_v49, %v143_v49  ;;  %v217_v59 = vmul.f32 %v144_v53, %v144_v53  ;;  %v218_v63 = vmul.f32 %v145_v57, %v145_v57  ;;  %v147_v1 = vld [vmem:[%s590_s19 + $0x90] sm:$0xff]  ;;  %v219_v3 = vmul.f32 %v146_v61, %v146_v61  ;;  %v148_v5 = vld [vmem:[%s590_s19 + $0x98] sm:$0xff] }
  0x42   : > { %v165_v18 = vadd.f32 %v164_v14, %v133_v9  ;;  %v236_v20 = vadd.f32 %v235_v16, %v205_v11  ;;  %v220_v7 = vmul.f32 %v147_v1, %v147_v1  ;;  %v149_v9 = vld [vmem:[%s590_s19 + $0xa0] sm:$0xff]  ;;  %v221_v11 = vmul.f32 %v148_v5, %v148_v5  ;;  %p426_p5 = pneg %p425_p4 }
  0x44   : > { %v166_v22 = vadd.f32 %v165_v18, %v134_v13  ;;  %v237_v24 = vadd.f32 %v236_v20, %v206_v15  ;;  %v150_v13 = vld [vmem:[%s590_s19 + $0xa8] sm:$0xff]  ;;  %v222_v15 = vmul.f32 %v149_v9, %v149_v9  ;;  %p433_p0 = pnand %p432_p12, %p426_p5 }
  0x46   : > { %v167_v26 = vadd.f32 %v166_v22, %v135_v17  ;;  %v238_v28 = vadd.f32 %v237_v24, %v207_v19  ;;  %v151_v17 = vld [vmem:[%s590_s19 + $0xb0] sm:$0xff]  ;;  %v223_v19 = vmul.f32 %v150_v13, %v150_v13 }
  0x48   : > { %v168_v30 = vadd.f32 %v167_v26, %v136_v21  ;;  %v239_v32 = vadd.f32 %v238_v28, %v208_v23  ;;  %v152_v21 = vld [vmem:[%s590_s19 + $0xb8] sm:$0xff]  ;;  %v224_v23 = vmul.f32 %v151_v17, %v151_v17 }
  0x4a   : > { %v169_v34 = vadd.f32 %v168_v30, %v137_v25  ;;  %v240_v36 = vadd.f32 %v239_v32, %v209_v27  ;;  %v153_v25 = vld [vmem:[%s590_s19 + $0xc0] sm:$0xff]  ;;  %v225_v27 = vmul.f32 %v152_v21, %v152_v21 }
  0x4c   : > { %v170_v38 = vadd.f32 %v169_v34, %v138_v29  ;;  %v241_v40 = vadd.f32 %v240_v36, %v210_v31  ;;  %v154_v29 = vld [vmem:[%s590_s19 + $0xc8] sm:$0xff]  ;;  %v226_v31 = vmul.f32 %v153_v25, %v153_v25 }
  0x4e   : > { %v171_v42 = vadd.f32 %v170_v38, %v139_v33  ;;  %v242_v44 = vadd.f32 %v241_v40, %v211_v35  ;;  %v155_v33 = vld [vmem:[%s590_s19 + $0xd0] sm:$0xff]  ;;  %v227_v35 = vmul.f32 %v154_v29, %v154_v29 }
  0x50   : > { %v172_v46 = vadd.f32 %v171_v42, %v140_v37  ;;  %v243_v48 = vadd.f32 %v242_v44, %v212_v39  ;;  %v156_v37 = vld [vmem:[%s590_s19 + $0xd8] sm:$0xff]  ;;  %v228_v39 = vmul.f32 %v155_v33, %v155_v33 }
  0x52   : > { %v173_v50 = vadd.f32 %v172_v46, %v141_v41  ;;  %v244_v52 = vadd.f32 %v243_v48, %v213_v43  ;;  %v157_v41 = vld [vmem:[%s590_s19 + $0xe0] sm:$0xff]  ;;  %v229_v43 = vmul.f32 %v156_v37, %v156_v37 }
  0x54   : > { %v174_v54 = vadd.f32 %v173_v50, %v142_v45  ;;  %v245_v56 = vadd.f32 %v244_v52, %v214_v47  ;;  %v158_v45 = vld [vmem:[%s590_s19 + $0xe8] sm:$0xff]  ;;  %v230_v47 = vmul.f32 %v157_v41, %v157_v41 }
  0x56   : > { %v175_v58 = vadd.f32 %v174_v54, %v143_v49  ;;  %v246_v60 = vadd.f32 %v245_v56, %v215_v51  ;;  %v159_v49 = vld [vmem:[%s590_s19 + $0xf0] sm:$0xff]  ;;  %v231_v51 = vmul.f32 %v158_v45, %v158_v45 }
  0x58   : > { %v176_v62 = vadd.f32 %v175_v58, %v144_v53  ;;  %v247_v0 = vadd.f32 %v246_v60, %v216_v55  ;;  %v160_v53 = vld [vmem:[%s590_s19 + $0xf8] sm:$0xff]  ;;  %v232_v55 = vmul.f32 %v159_v49, %v159_v49 }
  0x59   : > { %v233_v58 = vmul.f32 %v160_v53, %v160_v53 }
  0x5a   : > { %v177_v2 = vadd.f32 %v176_v62, %v145_v57  ;;  %v248_v4 = vadd.f32 %v247_v0, %v217_v59 }
  0x5c   : > { %v178_v6 = vadd.f32 %v177_v2, %v146_v61  ;;  %v249_v8 = vadd.f32 %v248_v4, %v218_v63 }
  0x5e   : > { %v179_v10 = vadd.f32 %v178_v6, %v147_v1  ;;  %v250_v12 = vadd.f32 %v249_v8, %v219_v3 }
  0x60   : > { %v180_v14 = vadd.f32 %v179_v10, %v148_v5  ;;  %v251_v16 = vadd.f32 %v250_v12, %v220_v7  ;;  %v161_v7 = vld [vmem:[#allocation5] sm:$0x1]  ;;  %v201_v12 = vld [vmem:[#allocation5 + $0x1] sm:$0x1] }
  0x62   : > { %v181_v18 = vadd.f32 %v180_v14, %v149_v9  ;;  %v252_v20 = vadd.f32 %v251_v16, %v221_v11 }
  0x64   : > { %v182_v22 = vadd.f32 %v181_v18, %v150_v13  ;;  %v253_v24 = vadd.f32 %v252_v20, %v222_v15 }
  0x66   : > { %v183_v26 = vadd.f32 %v182_v22, %v151_v17  ;;  %v254_v28 = vadd.f32 %v253_v24, %v223_v19 }
  0x68   : > { %v184_v30 = vadd.f32 %v183_v26, %v152_v21  ;;  %v255_v32 = vadd.f32 %v254_v28, %v224_v23 }
  0x6a   : > { %v185_v34 = vadd.f32 %v184_v30, %v153_v25  ;;  %v256_v36 = vadd.f32 %v255_v32, %v225_v27 }
  0x6c   : > { %v186_v38 = vadd.f32 %v185_v34, %v154_v29  ;;  %v257_v40 = vadd.f32 %v256_v36, %v226_v31 }
  0x6e   : > { %v187_v42 = vadd.f32 %v186_v38, %v155_v33  ;;  %v258_v44 = vadd.f32 %v257_v40, %v227_v35 }
  0x70   : > { %v188_v46 = vadd.f32 %v187_v42, %v156_v37  ;;  %v259_v48 = vadd.f32 %v258_v44, %v228_v39 }
  0x72   : > { %v189_v50 = vadd.f32 %v188_v46, %v157_v41  ;;  %v260_v52 = vadd.f32 %v259_v48, %v229_v43 }
  0x74   : > { %v190_v54 = vadd.f32 %v189_v50, %v158_v45  ;;  %v261_v56 = vadd.f32 %v260_v52, %v230_v47 }
  0x76   : > { %v191_v57 = vadd.f32 %v190_v54, %v159_v49  ;;  %v262_v59 = vadd.f32 %v261_v56, %v231_v51 }
  0x78   : > { %v192_v60 = vadd.f32 %v191_v57, %v160_v53  ;;  %v263_v61 = vadd.f32 %v262_v59, %v232_v55 }
  0x7a   : > { %v193_v62 = vrot.slane %v192_v60, 4  ;;  %v264_v63 = vadd.f32 %v263_v61, %v233_v58 }
  0x7c   : > { %v194_v0 = vadd.f32 %v193_v62, %v192_v60  ;;  %v265_v1 = vrot.slane %v264_v63, 4 }
  0x7e   : > { %v195_v2 = vrot.slane %v194_v0, 2  ;;  %v266_v3 = vadd.f32 %v265_v1, %v264_v63 }
  0x80   : > { %v196_v4 = vadd.f32 %v195_v2, %v194_v0  ;;  %v267_v5 = vrot.slane %v266_v3, 2 }
  0x82   : > { %v197_v6 = vrot.slane %v196_v4, 1  ;;  %v268_v8 = vadd.f32 %v267_v5, %v266_v3 }
  0x84   : > { %v198_v9 = vadd.f32 %v197_v6, %v196_v4  ;;  %v269_v10 = vrot.slane %v268_v8, 1 }
  0x86   : > { %v199_v11 = vadd.f32 %v198_v9, %v161_v7  ;;  %v270_v13 = vadd.f32 %v269_v10, %v268_v8 }
  0x88   : > { %200 = vst [vmem:[#allocation5] sm:$0x1] %v199_v11  ;;  %v271_v14 = vadd.f32 %v270_v13, %v201_v12 }
  0x8a   : > { %272 = vst [vmem:[#allocation5 + $0x1] sm:$0x1] %v271_v14 }
  0x8b   : > { %436 = shalt.err (!%p433_p0)
}
  0x8c   : > { %s437_s23 = scalar_lea.hbm %s666_s1, 128 }
  0x8d   : > { %p438_p1 = scmp.ne.s32.totalorder %s666_s1, %s437_s23  ;;  %p443_p13 = scmp.lt.u32.totalorder %s437_s23, %s666_s1 }
  0x8f   : > { %p439_p2 = pnand %p438_p1, %p355_p7 }
  0x91   : > { %p440_p11 = pneg %p439_p2 }
  0x93   : > { %p445_p3 = pnand %p443_p13, %p440_p11 }
  0x95   : > { %448 = shalt.err (!%p445_p3)
}
  0x96   : > { %347 = dma.vmem_to_hbm [thread:$0]  (%p355_p7), %s281_s15, 128, %s666_s1, [#allocation4]  }
  0x97   : > { %470 = dma.done.wait (%p355_p7), [#allocation4], 128  }
  0x98   : > { %472 = vsyncadd (%p355_p7), [#allocation4], 4294967168 }
  0x99 PF: > { %p12_p9 = scmp.ge.s32.totalorder %s526_s11, 4   ;;  %s670_s6 = smov %s479_s7 }
  0x9a   : > { %s671_s7 = smov %s483_s8  ;;  %s672_s8 = smov %s536_s14 }
  0x9b   : > { %s673_s9 = smov %s526_s11  ;;  %14 = sbr.rel (!%p12_p9) target bundleno = 4 (0x4), region = 65 }
  0xa2   :  { %293 = vsyncpa [#allocation3], 1 }
  0xa3   :  { %295 = vsyncpa [#allocation3 + $0x1], 1 }
  0xa4   :  { %296 = vsyncpa [#allocation4], 1 }
  0xa5   :  { %298 = vsyncpa [#allocation4 + $0x1], 1 }

</bundles_post_ra>
